<compile_context>
chip_gen: v7x
topology: tpu7x:2x2x1
jax: 0.10.0
libtpu: 0.0.40
codegen_flags: <defaults>
</compile_context>

<pallas_src>
import math

import jax
import jax.numpy as jnp
from jax.experimental import pallas as pl
from jax.experimental.pallas import tpu as pltpu


# ---------------------------------------------------------------------------
# Kernel
# ---------------------------------------------------------------------------
def actor_critic_kernel(
    const_ref,                 # (1,1) SMEM: -sum(log std) - 0.5*A*log(2*pi)
    xT_ref, aT_ref,            # (S, TB) bf16, (A, TB) f32 -- batch on lanes
    w1_ref, b1_ref,            # (2H, S) bf16, (2H, 1) f32  [actor|critic] L1
    w2_ref, b2_ref,            # (2H, 2H) bf16, (2H, 1) f32 block-diag L2
    w3_ref, b3_ref,            # (A+1, 2H) bf16, (A+1, 1) f32 [mu rows|value]
    inv_std_ref,               # (A, 1) f32 = 1 / (std * sqrt(2))
    out_ref,                   # (2, TB) f32: row 0 = log prob, row 1 = value
):
    A = aT_ref.shape[0]

    # Fused actor+critic MLP: 3 MXU passes, bf16 operands, f32 accumulation.
    h = jnp.tanh(jnp.dot(w1_ref[...], xT_ref[...],
                         preferred_element_type=jnp.float32) + b1_ref[...])
    h = jnp.tanh(jnp.dot(w2_ref[...], h.astype(jnp.bfloat16),
                         preferred_element_type=jnp.float32) + b2_ref[...])
    o3 = (jnp.dot(w3_ref[...], h.astype(jnp.bfloat16),
                  preferred_element_type=jnp.float32) + b3_ref[...])   # (A+1,TB)

    # Actor mean (tanh only on the mu rows), Gaussian quadratic form in f32.
    muT = jnp.tanh(o3[:A, :])                                          # (A, TB)
    z = (aT_ref[...] - muT) * inv_std_ref[...]                         # (A, TB)
    quad = jnp.sum(z * z, axis=0, keepdims=True)                       # (1, TB)
    logp_row = const_ref[0, 0] - quad                                  # (1, TB)

    # Critic value = last row of the fused layer-3 output (static slice; no
    # iota / select / cross-sublane reduction).
    val_row = o3[A:A + 1, :]                                           # (1, TB)

    # Lane-dense packed output: two direct sub-row stores, lanes stay unmasked.
    out_ref[0:1, :] = logp_row
    out_ref[1:2, :] = val_row


# ---------------------------------------------------------------------------
# Batch tiling: pad to a multiple of 256, even grid (>=2), tiles <= 8192 lanes
# ---------------------------------------------------------------------------
def _pick_batch_tiling(batch):
    LANE = 128
    MAX_TB = 8192
    # Pad so the batch splits into an even number of lane-dense tiles: the two
    # v7x TensorCores balance, and on single-TC chips the extra grid step is
    # ~0.35us -- negligible against the padded lanes' free MXU slack.
    padded = -(-batch // (2 * LANE)) * (2 * LANE)
    num_tiles = -(-padded // MAX_TB)
    if num_tiles % 2:
        num_tiles += 1
    tb = -(-padded // (num_tiles * LANE)) * LANE
    padded = tb * num_tiles
    return padded, tb, num_tiles


# ---------------------------------------------------------------------------
# Wrapper
# ---------------------------------------------------------------------------
def actor_critic_calculation(states, actions, params):
    """Returns (epoch_actlogprobs (B,), critic_values (B,), entropy (B,))."""
    B, S = states.shape
    A = actions.shape[1]
    H2 = params["w1T"].shape[0]          # 2 * h_neurons

    Bp, TB, num_tiles = _pick_batch_tiling(B)

    # Batch on the lane axis; zero-pad to Bp so every tile is a 128-multiple.
    statesT = jnp.pad(jnp.transpose(states).astype(jnp.bfloat16),
                      ((0, 0), (0, Bp - B)))                 # (S, Bp) bf16
    actionsT = jnp.pad(jnp.transpose(actions).astype(jnp.float32),
                       ((0, 0), (0, Bp - B)))                # (A, Bp) f32

    resident = lambda i: (0, 0)          # weights stay VMEM-resident
    tiled = lambda i: (0, i)             # batch tiles move along the lane axis

    in_specs = [
        pl.BlockSpec(memory_space=pltpu.MemorySpace.SMEM),   # logp constant
        pl.BlockSpec((S, TB), tiled),
        pl.BlockSpec((A, TB), tiled),
        pl.BlockSpec((H2, S), resident),
        pl.BlockSpec((H2, 1), resident),
        pl.BlockSpec((H2, H2), resident),
        pl.BlockSpec((H2, 1), resident),
        pl.BlockSpec((A + 1, H2), resident),
        pl.BlockSpec((A + 1, 1), resident),
        pl.BlockSpec((A, 1), resident),
    ]
    out_spec = pl.BlockSpec((2, TB), tiled)

    packed_out = pl.pallas_call(
        actor_critic_kernel,
        out_shape=jax.ShapeDtypeStruct((2, Bp), jnp.float32),
        grid=(num_tiles,),
        in_specs=in_specs,
        out_specs=out_spec,
        compiler_params=pltpu.CompilerParams(
            dimension_semantics=("parallel",)),
    )(
        params["logp_const"], statesT, actionsT,
        params["w1T"], params["b1"], params["w2T"], params["b2"],
        params["w3T"], params["b3"], params["inv_std"],
    )

    logp = packed_out[0, :B]
    values = packed_out[1, :B]
    # Entropy of N(mu, diag(std^2)) is batch-independent -> wrapper constant.
    entropy = jnp.full((B,), params["entropy_const"], dtype=jnp.float32)
    return logp, values, entropy


# ---------------------------------------------------------------------------
# Parameter construction
# ---------------------------------------------------------------------------
def init_params(key, dim_states, dim_acts, h_neurons, action_std):
    """Raw per-layer params mimicking nn.Linear init (weights stored (in, out))."""
    def linear(k, fan_in, fan_out):
        kw, kb = jax.random.split(k)
        bound = 1.0 / math.sqrt(fan_in)
        w = jax.random.uniform(kw, (fan_in, fan_out), jnp.float32, -bound, bound)
        b = jax.random.uniform(kb, (1, fan_out), jnp.float32, -bound, bound)
        return w, b

    keys = jax.random.split(key, 6)
    w1, b1 = linear(keys[0], dim_states, h_neurons)
    w2, b2 = linear(keys[1], h_neurons, h_neurons)
    w3, b3 = linear(keys[2], h_neurons, dim_acts)
    v1, c1 = linear(keys[3], dim_states, h_neurons)
    v2, c2 = linear(keys[4], h_neurons, h_neurons)
    v3, c3 = linear(keys[5], h_neurons, 1)
    std = jnp.full((1, dim_acts), action_std, dtype=jnp.float32)
    return dict(w1=w1, b1=b1, w2=w2, b2=b2, w3=w3, b3=b3,
                v1=v1, c1=c1, v2=v2, c2=c2, v3=v3, c3=c3, std=std)


def pack_params(raw):
    """Fuse actor+critic weights (concat / block-diag), transpose for the
    batch-on-lanes layout, store matmul operands in bf16, and precompute all
    std-derived constants."""
    w1, b1, w2, b2, w3, b3 = (raw["w1"], raw["b1"], raw["w2"],
                              raw["b2"], raw["w3"], raw["b3"])
    v1, c1, v2, c2, v3, c3 = (raw["v1"], raw["c1"], raw["v2"],
                              raw["c2"], raw["v3"], raw["c3"])
    std = raw["std"]                              # (1, A)
    H = w2.shape[0]
    A = w3.shape[1]
    f32 = jnp.float32
    bf16 = jnp.bfloat16

    w1T = jnp.concatenate([w1.T, v1.T], axis=0)                       # (2H, S)
    b1c = jnp.concatenate([b1, c1], axis=1).T                         # (2H, 1)

    zH = jnp.zeros((H, H), f32)
    w2T = jnp.block([[w2.T, zH], [zH, v2.T]])                         # (2H, 2H)
    b2c = jnp.concatenate([b2, c2], axis=1).T                         # (2H, 1)

    w3T = jnp.concatenate(
        [jnp.concatenate([w3.T, jnp.zeros((A, H), f32)], axis=1),
         jnp.concatenate([jnp.zeros((1, H), f32), v3.T], axis=1)],
        axis=0)                                                       # (A+1, 2H)
    b3c = jnp.concatenate([b3, c3], axis=1).T                         # (A+1, 1)

    # 0.5 factor of the quadratic form is folded into inv_std (1/(std*sqrt(2))).
    inv_std = (1.0 / (std * jnp.sqrt(jnp.float32(2.0)))).T            # (A, 1)
    sum_log_std = jnp.sum(jnp.log(std))
    logp_const = jnp.reshape(
        -sum_log_std - 0.5 * A * math.log(2.0 * math.pi), (1, 1)).astype(f32)
    entropy_const = (0.5 * A * (1.0 + math.log(2.0 * math.pi))
                     + sum_log_std).astype(f32)

    return dict(w1T=w1T.astype(bf16), b1=b1c.astype(f32),
                w2T=w2T.astype(bf16), b2=b2c.astype(f32),
                w3T=w3T.astype(bf16), b3=b3c.astype(f32),
                inv_std=inv_std.astype(f32), logp_const=logp_const,
                entropy_const=entropy_const)


# ---------------------------------------------------------------------------
# Pure-JAX reference (unfused, f32) for correctness checking
# ---------------------------------------------------------------------------
def reference_calculation(states, actions, raw):
    h = jnp.tanh(states @ raw["w1"] + raw["b1"])
    h = jnp.tanh(h @ raw["w2"] + raw["b2"])
    mu = jnp.tanh(h @ raw["w3"] + raw["b3"])
    std = raw["std"]
    A = mu.shape[-1]
    z = (actions - mu) / std
    logp = (-0.5 * jnp.sum(z * z, axis=-1)
            - jnp.sum(jnp.log(std))
            - 0.5 * A * math.log(2.0 * math.pi))
    ent = jnp.full((states.shape[0],),
                   0.5 * A * (1.0 + math.log(2.0 * math.pi))
                   + jnp.sum(jnp.log(std)))
    hc = jnp.tanh(states @ raw["v1"] + raw["c1"])
    hc = jnp.tanh(hc @ raw["v2"] + raw["c2"])
    val = (hc @ raw["v3"] + raw["c3"])[:, 0]
    return logp, val, ent


if __name__ == "__main__":
    # BipedalWalker-ish sizes, kept small.
    dim_states, dim_acts, h_neurons, action_std = 24, 4, 32, 0.5
    batch = 8

    key = jax.random.PRNGKey(0)
    kp, ks, ka = jax.random.split(key, 3)
    raw = init_params(kp, dim_states, dim_acts, h_neurons, action_std)
    params = pack_params(raw)
    states = jax.random.normal(ks, (batch, dim_states), dtype=jnp.float32)
    actions = jax.random.normal(ka, (batch, dim_acts), dtype=jnp.float32)

    logp, values, entropy = actor_critic_calculation(states, actions, params)
    jax.block_until_ready((logp, values, entropy))

    r_logp, r_val, r_ent = reference_calculation(states, actions, raw)
    # bf16 MXU operands (f32 accumulation/activations) -> looser tolerances
    # than a pure-f32 comparison; logp amplifies mu error via the quad form.
    assert jnp.allclose(logp, r_logp, atol=1.5e-1, rtol=2e-2), "logprob mismatch"
    assert jnp.allclose(values, r_val, atol=5e-2, rtol=1e-2), "value mismatch"
    assert jnp.allclose(entropy, r_ent, atol=1e-5, rtol=1e-5), "entropy mismatch"

    print("KERNEL_OK")
</pallas_src>

<mosaic_0001>
module attributes {stable_mosaic.version = 11 : i64} {
  func.func @actor_critic_kernel(%arg0: i32, %arg1: memref<1x1xf32, #tpu.memory_space<smem>>, %arg2: memref<24x128xbf16, #tpu.memory_space<vmem>>, %arg3: memref<4x128xf32, #tpu.memory_space<vmem>>, %arg4: memref<64x24xbf16, #tpu.memory_space<vmem>>, %arg5: memref<64x1xf32, #tpu.memory_space<vmem>>, %arg6: memref<64x64xbf16, #tpu.memory_space<vmem>>, %arg7: memref<64x1xf32, #tpu.memory_space<vmem>>, %arg8: memref<5x64xbf16, #tpu.memory_space<vmem>>, %arg9: memref<5x1xf32, #tpu.memory_space<vmem>>, %arg10: memref<4x1xf32, #tpu.memory_space<vmem>>, %arg11: memref<2x128xf32, #tpu.memory_space<vmem>>) attributes {dimension_semantics = [#tpu.dimension_semantics<parallel>], iteration_bounds = array<i64: 2>, scalar_prefetch = 0 : i64, scratch_operands = 0 : i64, tpu.core_type = #tpu.core_type<tc>, window_params = [{transform_indices = @transform_0, window_bounds = array<i64: 1, 1>}, {transform_indices = @transform_1, window_bounds = array<i64: 24, 128>}, {transform_indices = @transform_2, window_bounds = array<i64: 4, 128>}, {pipeline_mode = #tpu.pipeline_mode<synchronous>, transform_indices = @transform_3, window_bounds = array<i64: 64, 24>}, {pipeline_mode = #tpu.pipeline_mode<synchronous>, transform_indices = @transform_4, window_bounds = array<i64: 64, 1>}, {pipeline_mode = #tpu.pipeline_mode<synchronous>, transform_indices = @transform_5, window_bounds = array<i64: 64, 64>}, {pipeline_mode = #tpu.pipeline_mode<synchronous>, transform_indices = @transform_6, window_bounds = array<i64: 64, 1>}, {pipeline_mode = #tpu.pipeline_mode<synchronous>, transform_indices = @transform_7, window_bounds = array<i64: 5, 64>}, {pipeline_mode = #tpu.pipeline_mode<synchronous>, transform_indices = @transform_8, window_bounds = array<i64: 5, 1>}, {pipeline_mode = #tpu.pipeline_mode<synchronous>, transform_indices = @transform_9, window_bounds = array<i64: 4, 1>}, {transform_indices = @transform_10, window_bounds = array<i64: 2, 128>}]} {
    %c0 = arith.constant 0 : index
    %c0_0 = arith.constant 0 : index
    %0 = vector.load %arg4[%c0, %c0_0] : memref<64x24xbf16, #tpu.memory_space<vmem>>, vector<64x24xbf16>
    %c0_1 = arith.constant 0 : index
    %c0_2 = arith.constant 0 : index
    %1 = vector.load %arg2[%c0_1, %c0_2] : memref<24x128xbf16, #tpu.memory_space<vmem>>, vector<24x128xbf16>
    %cst = arith.constant dense<0.000000e+00> : vector<64x128xf32>
    %2 = tpu.matmul %0, %1, %cst {dimension_numbers = #tpu.dot_dimension_numbers<[1], [0], [0], [1], [0, 0, 1, 1], [], []>} : vector<64x24xbf16>, vector<24x128xbf16>, vector<64x128xf32> -> vector<64x128xf32>
    %c0_3 = arith.constant 0 : index
    %c0_4 = arith.constant 0 : index
    %3 = vector.load %arg5[%c0_3, %c0_4] : memref<64x1xf32, #tpu.memory_space<vmem>>, vector<64x1xf32>
    %4 = vector.broadcast %3 : vector<64x1xf32> to vector<64x128xf32>
    %5 = arith.addf %2, %4 : vector<64x128xf32>
    %6 = math.tanh %5 : vector<64x128xf32>
    %c0_5 = arith.constant 0 : index
    %c0_6 = arith.constant 0 : index
    %7 = vector.load %arg6[%c0_5, %c0_6] : memref<64x64xbf16, #tpu.memory_space<vmem>>, vector<64x64xbf16>
    %8 = arith.truncf %6 : vector<64x128xf32> to vector<64x128xbf16>
    %cst_7 = arith.constant dense<0.000000e+00> : vector<64x128xf32>
    %9 = tpu.matmul %7, %8, %cst_7 {dimension_numbers = #tpu.dot_dimension_numbers<[1], [0], [0], [1], [0, 0, 1, 1], [], []>} : vector<64x64xbf16>, vector<64x128xbf16>, vector<64x128xf32> -> vector<64x128xf32>
    %c0_8 = arith.constant 0 : index
    %c0_9 = arith.constant 0 : index
    %10 = vector.load %arg7[%c0_8, %c0_9] : memref<64x1xf32, #tpu.memory_space<vmem>>, vector<64x1xf32>
    %11 = vector.broadcast %10 : vector<64x1xf32> to vector<64x128xf32>
    %12 = arith.addf %9, %11 : vector<64x128xf32>
    %13 = math.tanh %12 : vector<64x128xf32>
    %c0_10 = arith.constant 0 : index
    %c0_11 = arith.constant 0 : index
    %14 = vector.load %arg8[%c0_10, %c0_11] : memref<5x64xbf16, #tpu.memory_space<vmem>>, vector<5x64xbf16>
    %15 = arith.truncf %13 : vector<64x128xf32> to vector<64x128xbf16>
    %cst_12 = arith.constant dense<0.000000e+00> : vector<5x128xf32>
    %16 = tpu.matmul %14, %15, %cst_12 {dimension_numbers = #tpu.dot_dimension_numbers<[1], [0], [0], [1], [0, 0, 1, 1], [], []>} : vector<5x64xbf16>, vector<64x128xbf16>, vector<5x128xf32> -> vector<5x128xf32>
    %c0_13 = arith.constant 0 : index
    %c0_14 = arith.constant 0 : index
    %17 = vector.load %arg9[%c0_13, %c0_14] : memref<5x1xf32, #tpu.memory_space<vmem>>, vector<5x1xf32>
    %18 = vector.broadcast %17 : vector<5x1xf32> to vector<5x128xf32>
    %19 = arith.addf %16, %18 : vector<5x128xf32>
    %20 = vector.extract_strided_slice %19 {offsets = [0, 0], sizes = [4, 128], strides = [1, 1]} : vector<5x128xf32> to vector<4x128xf32>
    %21 = math.tanh %20 : vector<4x128xf32>
    %c0_15 = arith.constant 0 : index
    %c0_16 = arith.constant 0 : index
    %22 = vector.load %arg3[%c0_15, %c0_16] : memref<4x128xf32, #tpu.memory_space<vmem>>, vector<4x128xf32>
    %23 = arith.subf %22, %21 : vector<4x128xf32>
    %c0_17 = arith.constant 0 : index
    %c0_18 = arith.constant 0 : index
    %24 = vector.load %arg10[%c0_17, %c0_18] : memref<4x1xf32, #tpu.memory_space<vmem>>, vector<4x1xf32>
    %25 = vector.broadcast %24 : vector<4x1xf32> to vector<4x128xf32>
    %26 = arith.mulf %23, %25 : vector<4x128xf32>
    %27 = arith.mulf %26, %26 : vector<4x128xf32>
    %cst_19 = arith.constant dense<0.000000e+00> : vector<128xf32>
    %28 = vector.multi_reduction <add>, %27, %cst_19 [0] : vector<4x128xf32> to vector<128xf32>
    %29 = vector.shape_cast %28 : vector<128xf32> to vector<1x128xf32>
    %c0_20 = arith.constant 0 : index
    %c0_21 = arith.constant 0 : index
    %30 = memref.load %arg1[%c0_20, %c0_21] : memref<1x1xf32, #tpu.memory_space<smem>>
    %31 = vector.broadcast %30 : f32 to vector<1x128xf32>
    %32 = arith.subf %31, %29 : vector<1x128xf32>
    %33 = vector.extract_strided_slice %19 {offsets = [4, 0], sizes = [1, 128], strides = [1, 1]} : vector<5x128xf32> to vector<1x128xf32>
    %c0_22 = arith.constant 0 : index
    %c0_23 = arith.constant 0 : index
    %34 = vector.load %arg11[%c0_22, %c0_23] : memref<2x128xf32, #tpu.memory_space<vmem>>, vector<1x128xf32>
    tpu.vector_store %arg11[%c0_22, %c0_23], %32 {strides = array<i32>} : memref<2x128xf32, #tpu.memory_space<vmem>>, vector<1x128xf32>,
    %c1 = arith.constant 1 : index
    %c0_24 = arith.constant 0 : index
    %35 = vector.load %arg11[%c1, %c0_24] : memref<2x128xf32, #tpu.memory_space<vmem>>, vector<1x128xf32>
    tpu.vector_store %arg11[%c1, %c0_24], %33 {strides = array<i32>} : memref<2x128xf32, #tpu.memory_space<vmem>>, vector<1x128xf32>,
    return
  }
  func.func @transform_0(%arg0: i32) -> (i32, i32) {
    %c0_i32 = arith.constant 0 : i32
    %c0_i32_0 = arith.constant 0 : i32
    %c0_i32_1 = arith.constant 0 : i32
    return %c0_i32, %c0_i32_0 : i32, i32
  }
  func.func @transform_1(%arg0: i32) -> (i32, i32) {
    %c0_i32 = arith.constant 0 : i32
    %c0_i32_0 = arith.constant 0 : i32
    return %c0_i32, %arg0 : i32, i32
  }
  func.func @transform_2(%arg0: i32) -> (i32, i32) {
    %c0_i32 = arith.constant 0 : i32
    %c0_i32_0 = arith.constant 0 : i32
    return %c0_i32, %arg0 : i32, i32
  }
  func.func @transform_3(%arg0: i32) -> (i32, i32) {
    %c0_i32 = arith.constant 0 : i32
    %c0_i32_0 = arith.constant 0 : i32
    %c0_i32_1 = arith.constant 0 : i32
    return %c0_i32, %c0_i32_0 : i32, i32
  }
  func.func @transform_4(%arg0: i32) -> (i32, i32) {
    %c0_i32 = arith.constant 0 : i32
    %c0_i32_0 = arith.constant 0 : i32
    %c0_i32_1 = arith.constant 0 : i32
    return %c0_i32, %c0_i32_0 : i32, i32
  }
  func.func @transform_5(%arg0: i32) -> (i32, i32) {
    %c0_i32 = arith.constant 0 : i32
    %c0_i32_0 = arith.constant 0 : i32
    %c0_i32_1 = arith.constant 0 : i32
    return %c0_i32, %c0_i32_0 : i32, i32
  }
  func.func @transform_6(%arg0: i32) -> (i32, i32) {
    %c0_i32 = arith.constant 0 : i32
    %c0_i32_0 = arith.constant 0 : i32
    %c0_i32_1 = arith.constant 0 : i32
    return %c0_i32, %c0_i32_0 : i32, i32
  }
  func.func @transform_7(%arg0: i32) -> (i32, i32) {
    %c0_i32 = arith.constant 0 : i32
    %c0_i32_0 = arith.constant 0 : i32
    %c0_i32_1 = arith.constant 0 : i32
    return %c0_i32, %c0_i32_0 : i32, i32
  }
  func.func @transform_8(%arg0: i32) -> (i32, i32) {
    %c0_i32 = arith.constant 0 : i32
    %c0_i32_0 = arith.constant 0 : i32
    %c0_i32_1 = arith.constant 0 : i32
    return %c0_i32, %c0_i32_0 : i32, i32
  }
  func.func @transform_9(%arg0: i32) -> (i32, i32) {
    %c0_i32 = arith.constant 0 : i32
    %c0_i32_0 = arith.constant 0 : i32
    %c0_i32_1 = arith.constant 0 : i32
    return %c0_i32, %c0_i32_0 : i32, i32
  }
  func.func @transform_10(%arg0: i32) -> (i32, i32) {
    %c0_i32 = arith.constant 0 : i32
    %c0_i32_0 = arith.constant 0 : i32
    return %c0_i32, %arg0 : i32, i32
  }
}

</mosaic_0001>

<bundles_post_ra>
// kernel: tpu_custom_call.1
= control target key start
LH: loop header
LB: loop body
LE: loop exit
PB: predicated region body
PF: predicated region fallthrough
CT: control target
= control target key end

     0   :  { %s1452_s0 = inlined_call_operand.<no memory space> [shape: f32[1,1], index: 0, kind: input, shape index: {}]   ;;  %s1453_s1 = inlined_call_operand.vmem [shape: bf16[24,256], index: 1, kind: input, shape index: {}]   ;;  %s1454_s2 = inlined_call_operand.vmem [shape: f32[4,256], index: 2, kind: input, shape index: {}]   ;;  %s1455_s3 = inlined_call_operand.vmem [shape: bf16[64,24], index: 3, kind: input, shape index: {}]   ;;  %s1456_s4 = inlined_call_operand.vmem [shape: f32[64,1], index: 4, kind: input, shape index: {}]   ;;  %s1457_s5 = inlined_call_operand.vmem [shape: bf16[64,64], index: 5, kind: input, shape index: {}]   ;;  %s1458_s6 = inlined_call_operand.vmem [shape: f32[64,1], index: 6, kind: input, shape index: {}]   ;;  %s1459_s7 = inlined_call_operand.vmem [shape: bf16[5,64], index: 7, kind: input, shape index: {}]   ;;  %s1460_s8 = inlined_call_operand.vmem [shape: f32[5,1], index: 8, kind: input, shape index: {}]   ;;  %s1461_s9 = inlined_call_operand.vmem [shape: f32[4,1], index: 9, kind: input, shape index: {}]   ;;  %s1462_s10 = inlined_call_operand.hbm [shape: f32[2,256], index: 10, kind: output, shape index: {}]  }
   0x1   :  { %15 = sst [smem:[#allocation2]] %s1452_s0 }
   0x2   :  { %16 = vsyncpa [#allocation5], 0 }
   0x3   :  { %18 = vsyncpa [#allocation5 + $0x1], 0  ;;  %s1244_s15 = smov 0   ;;  %s1246_s16 = smov 0  }
   0x4   :  { %s1248_s17 = smov 0   ;;  %s1250_s18 = smov 0  }
   0x5 LB: > { %s1265_s0 = sadd.s32 4294967295, %s1180_s18   ;;  %s938_s19 = sadd.s32 4294967294, %s1180_s18   ;;  %s1180_s18 = sphi %s1250_s18, %s1468_s18   ;;  %s1176_s17 = sphi %s1248_s17, %s1467_s17   ;;  %s1172_s16 = sphi %s1246_s16, %s1466_s16   ;;  %s1168_s15 = sphi %s1244_s15, %s1465_s15  }
   0x6   : > { %s1269_s20 = sadd.s32 1, %s1180_s18   ;;  %s52_s21 = sadd.s32 1, %s1176_s17 }
   0x7   : > { %s49_s22 = ssub.s32 %s1180_s18, %s1269_s20  ;;  %p59_p0 = scmp.ne.s32.totalorder %s1176_s17, %s1172_s16 }
   0x8   : > { %p50_p1 = scmp.eq.s32.totalorder %s49_s22, 0  ;;  %p60_p2 = scmp.eq.s32.totalorder %s1180_s18, 0 }
   0x9   : > { %p262_p3 = scmp.eq.s32.totalorder %s1265_s0, 1  ;;  %p267_p4 = scmp.ne.s32.totalorder %s1172_s16, %s1168_s15 }
   0xa   : > { %s1281_s23 = scalar_select %p50_p1, %s1176_s17, %s52_s21  }
   0xb   : > { %p61_p5 = por %p60_p2, %p59_p0  ;;  %p1283_p6 = por %p262_p3, %p59_p0 }
   0xc   : > { %p268_p7 = scmp.eq.s32.totalorder %s938_s19, 1  ;;  %p940_p9 = scmp.ge.s32.totalorder %s1180_s18, 2 }
   0xe   : > { %p1287_p8 = por %p268_p7, %p267_p4  ;;  %308 = sbr.rel (%p940_p9) target bundleno = 28 (0x1c), region = 48 }
  0x15   : > { %311 = sbr.rel (!%p61_p5) target bundleno = 28 (0x1c), region = 52  ;;  %s313_s26 = sand.u32 (%p61_p5), 1, %s1176_s17  }
  0x16   : > { %s941_s27 = sshll.u32 (%p61_p5), %s1180_s18, 2  ;;  %s1028_s28 = smul.u32 (%p61_p5), 12, %s313_s26 }
  0x17   : > { %s317_s11 = scalar_lea.vmem (%p61_p5), %s1453_s1, %s941_s27 }
  0x18   : > { %v333_v0 = vld [vmem:[%s317_s11] sm:$0xf] (%p61_p5)  ;;  %v335_v1 = vld [vmem:[%s317_s11 + $0x8] sm:$0xf] (%p61_p5)  ;;  %v337_v2 = vld [vmem:[%s317_s11 + $0x10] sm:$0xf] (%p61_p5) }
  0x19   : > { %s315_s12 = scalar_lea.vmem (%p61_p5), [#allocation3], %s1028_s28 }
  0x1a   : > { %334 = vst [vmem:[%s315_s12] sm:$0xf] (%p61_p5), %v333_v0  ;;  %336 = vst [vmem:[%s315_s12 + $0x4] sm:$0xf] (%p61_p5), %v335_v1 }
  0x1b   : > { %338 = vst [vmem:[%s315_s12 + $0x8] sm:$0xf] (%p61_p5), %v337_v2 }
  0x1c PF: > { %p942_p10 = scmp.ge.s32.totalorder %s1180_s18, 1  ;;  %p373_p11 = scmp.lt.s32.totalorder %s1180_s18, 3 }
  0x1e   : > { %p374_p12 = pnand %p942_p10, %p373_p11 }
  0x1f   : > { %s1302_s13 = sand.u32 (!%p374_p12), 1, %s1172_s16   ;;  %v1076_v3 = vld [vmem:[%s1455_s3] sm:$0xff] (!%p374_p12)   ;;  %vm514_vm0 = vcmask (!%p374_p12), 195584   ;;  %vm527_vm1 = vcmask (!%p374_p12), 1043456   ;;  %v1182_v6 = vmov (!%p374_p12), 0   ;;  %v439_v8 = vld [vmem:[%s1456_s4 + $0x10] sm:$0xff] (!%p374_p12) }
  0x20   : > { %377 = sbr.rel (%p374_p12) target bundleno = 796 (0x31c), region = 97  ;;  %991 = vmatprep.mubr.msk.bf16.mxu0 (!%p374_p12), %vm514_vm0, %v1076_v3  ;;  %1072 = vset.pattern.permute.xlu0 (!%p374_p12), %v1182_v6  ;;  %v437_v7 = vld [vmem:[%s1456_s4] sm:$0xff] (!%p374_p12)  ;;  %v438_v9 = vld [vmem:[%s1456_s4 + $0x8] sm:$0xff] (!%p374_p12)  ;;  %v440_v11 = vld [vmem:[%s1456_s4 + $0x18] sm:$0xff] (!%p374_p12)  ;;  %vm684_vm2 = vcmask (!%p374_p12), 523264   ;;  %vm1184_vm3 = vmmov (!%p374_p12), 0  }
  0x21   : > { %s1029_s14 = smul.u32 (!%p374_p12), 12, %s1302_s13  ;;  %1073 = vset.pattern.permute.xlu1 (!%p374_p12), %v1182_v6  ;;  %447 = vperm.xlu0 (!%p374_p12), %1072, %v437_v7   ;;  %v1077_v12 = vld [vmem:[%s1455_s3 + $0x8] sm:$0xff] (!%p374_p12)   ;;  %v1078_v13 = vld [vmem:[%s1455_s3 + $0x10] sm:$0xff] (!%p374_p12)   ;;  %v441_v14 = vld [vmem:[%s1456_s4 + $0x20] sm:$0xff] (!%p374_p12)  ;;  %s943_s19 = sshll.u32 (!%p374_p12), %s1302_s13, 1 }
  0x22   : > { %457 = vperm.xlu1 (!%p374_p12), %1073, %v439_v8   ;;  %v442_v15 = vld [vmem:[%s1456_s4 + $0x28] sm:$0xff] (!%p374_p12)  ;;  %v443_v16 = vld [vmem:[%s1456_s4 + $0x30] sm:$0xff] (!%p374_p12)  ;;  %v444_v17 = vld [vmem:[%s1456_s4 + $0x38] sm:$0xff] (!%p374_p12)  ;;  %p421_p13 = scmp.lt.s32.totalorder (!%p374_p12), %s1265_s0, 1  ;;  %s842_s30 = sld [smem:[#allocation2]] (!%p374_p12) }
  0x23   : > { %s382_s22 = scalar_lea.vmem (!%p374_p12), [#allocation3], %s1029_s14  ;;  %v1079_v18 = vld [vmem:[%s1455_s3 + $0x18] sm:$0xff] (!%p374_p12)   ;;  %v616_v19 = vld [vmem:[%s1458_s6] sm:$0xff] (!%p374_p12)  ;;  %v617_v20 = vld [vmem:[%s1458_s6 + $0x8] sm:$0xff] (!%p374_p12)  ;;  %s965_s11 = sshll.u32 (!%p374_p12), %s1265_s0, 5 }
  0x24   : > { %v1074_v4 = vld [vmem:[%s382_s22] sm:$0xff] (!%p374_p12)   ;;  %v1075_v5 = vld [vmem:[%s382_s22 + $0x8] ss:$0 sps:$4 sm:$0xff] (!%p374_p12)   ;;  %v619_v22 = vld [vmem:[%s1458_s6 + $0x18] sm:$0xff] (!%p374_p12)  ;;  %s420_s22 = scalar_lea.vmem (!%p374_p12), [#allocation4], %s943_s19 }
  0x25   : > { %987 = vmatprep.subr.bf16.mxu0 (!%p374_p12), %v1074_v4  ;;  %v529_v10 = vsel (!%p374_p12), %vm527_vm1, %v1075_v5, 0  ;;  %452 = vperm.xlu0 (!%p374_p12), %1072, %v438_v9   ;;  %v618_v21 = vld [vmem:[%s1458_s6 + $0x10] sm:$0xff] (!%p374_p12)  ;;  %v620_v23 = vld [vmem:[%s1458_s6 + $0x20] sm:$0xff] (!%p374_p12)  ;;  %v621_v24 = vld [vmem:[%s1458_s6 + $0x28] sm:$0xff] (!%p374_p12)  ;;  %s861_s12 = sshll.u32 (!%p374_p12), %s420_s22, 4  ;;  %s1410_s12 = int_to_ptr.vmem [resolvable:$true] %s861_s12 }
  0x26   : > { %988 = vmatpush3.bf16.msra.mxu0 (!%p374_p12), %v1074_v4  ;;  %462 = vperm.xlu1 (!%p374_p12), %1073, %v440_v11   ;;  %v622_v25 = vld [vmem:[%s1458_s6 + $0x30] sm:$0xff] (!%p374_p12)  ;;  %v623_v26 = vld [vmem:[%s1458_s6 + $0x38] sm:$0xff] (!%p374_p12)  ;;  %v775_v27 = vld [vmem:[%s1460_s8] sm:$0x1f] (!%p374_p12)  ;;  %s1118_s27 = scalar_lea.vmem (!%p374_p12), %s1410_s12, 32 }
  0x27   : > { %1027 = vmatprep.subr.msk.bf16.mxu0 %vm527_vm1, %v1075_v5  ;;  %v827_v28 = vld [vmem:[%s1461_s9] sm:$0xf]  ;;  %v1081_v2 = vld [vmem:[%s1457_s5 + $0x8] sm:$0xff]   ;;  %v1082_v3 = vld [vmem:[%s1457_s5 + $0x10] sm:$0xff]   ;;  %v1183_v5 = vmov 0.0   ;;  %s422_s21 = scalar_select %p421_p13, %s1265_s0, 1 }
  0x28   : > { %v1080_v29 = vld [vmem:[%s1457_s5] sm:$0xff]   ;;  %v1083_v4 = vld [vmem:[%s1457_s5 + $0x18] sm:$0xff]   ;;  %p1119_p0 = scmp.ne.s32.totalorder %s1410_s12, %s1118_s27  ;;  %s1185_s0 = smov [#allocation4]  }
  0x29   : > { %467 = vperm.xlu0 %1072, %v441_v14   ;;  %1007 = vmatprep.mubr.msk.bf16.mxu1 %vm684_vm2, %v1080_v29  ;;  %s944_s26 = sshll.u32 %s422_s21, 2  ;;  %s1408_s21 = scalar_lea.hbm %s1462_s10, %s965_s11 }
  0x2a   : > { %990 = vmatpush3.bf16.msra.mxu0 %v529_v10  ;;  %472 = vperm.xlu1 %1073, %v442_v15   ;;  %s424_s29 = scalar_lea.vmem %s1454_s2, %s944_s26  ;;  %s848_s26 = scalar_lea.sflag [#allocation5], %s1302_s13 }
  0x2b   : > { %1015 = vmatprep.subr.bf16.mxu0 %v1183_v5  ;;  %p1120_p1 = pnand %p1119_p0, %p1283_p6  ;;  %s1122_s28 = sshll.u32 %s1185_s0, 4  ;;  %s1123_s28 = int_to_ptr.vmem [resolvable:$false] %s1122_s28 }
  0x2c   : > { %p1125_p3 = scmp.lt.s32.totalorder %s1410_s12, %s1123_s28 }
  0x2d   : > { %992 = vmatmul.mubr.msk.bf16.vlgmr.msra.gmra.mrb[0].mxu0 %vm514_vm0, %v1077_v12  ;;  %477 = vperm.xlu0 %1072, %v443_v16   ;;  %p1121_p2 = pneg %p1120_p1 }
  0x2e   : > { %995 = vmatprep.mubr.msk.bf16.mxu0 %vm514_vm0, %v1078_v13  ;;  %482 = vperm.xlu1 %1073, %v444_v17  }
  0x31   : > { %626 = vperm.xlu0 %1072, %v616_v19  }
  0x32   : > { %631 = vperm.xlu1 %1073, %v617_v20  }
  0x35   : > { %996 = vmatmul.mubr.msk.bf16.gmra.mrb[4].mxu0 %vm514_vm0, %v1079_v18  ;;  %636 = vperm.xlu0 %1072, %v618_v21  }
  0x36   : > { %641 = vperm.xlu1 %1073, %v619_v22   ;;  %1023 = vmatprep.mubr.msk.bf16.mxu0 %vm1184_vm3, %v1183_v5 }
  0x39   : > { %646 = vperm.xlu0 %1072, %v620_v23  }
  0x3a   : > { %651 = vperm.xlu1 %1073, %v621_v24  }
  0x3d   : > { %656 = vperm.xlu0 %1072, %v622_v25  }
  0x3e   : > { %661 = vperm.xlu1 %1073, %v623_v26  }
  0x41   : > { %778 = vperm.xlu0 %1072, %v775_v27  }
  0x42   : > { %830 = vperm.xlu1 %1073, %v827_v28  }
  0xa0   : > { %v448_v30 = vpop.permute.xlu0 %447 }
  0xa1   : > { %v458_v31 = vpop.permute.xlu1 %457 }
  0xa4   : > { %v453_v32 = vpop.permute.xlu0 %452 }
  0xa5   : > { %v463_v33 = vpop.permute.xlu1 %462 }
  0xa8   : > { %v468_v37 = vpop.permute.xlu0 %467 }
  0xa9   : > { %v473_v42 = vpop.permute.xlu1 %472 }
  0xac   : > { %v478_v44 = vpop.permute.xlu0 %477 }
  0xad   : > { %v483_v48 = vpop.permute.xlu1 %482 }
  0xb0   : > { %v627_v6 = vpop.permute.xlu0 %626 }
  0xb1   : > { %v632_v7 = vpop.permute.xlu1 %631 }
  0xb4   : > { %v637_v8 = vpop.permute.xlu0 %636 }
  0xb5   : > { %v642_v9 = vpop.permute.xlu1 %641 }
  0xb8   : > { %v647_v13 = vpop.permute.xlu0 %646 }
  0xb9   : > { %v652_v18 = vpop.permute.xlu1 %651 }
  0xbc   : > { %v657_v20 = vpop.permute.xlu0 %656 }
  0xbd   : > { %v662_v24 = vpop.permute.xlu1 %661 }
 0x100   : > { %v993_v34 = vpop.f32.mrb[0].mxu0 }
 0x101   : > { %v574_v35 = vadd.f32 %v993_v34, %v458_v31  ;;  %v565_v36 = vpop.f32.mrb[1].mxu0 }
 0x102   : > { %v566_v38 = vadd.f32 %v565_v36, %v448_v30  ;;  %v994_v39 = vpop.f32.mrb[2].mxu0 }
 0x103   : > { %1084 = vtanh.f32 %v574_v35  ;;  %v577_v40 = vadd.f32 %v994_v39, %v463_v33  ;;  %v568_v41 = vpop.f32.mrb[3].mxu0 }
 0x104   : > { %1086 = vtanh.f32 %v566_v38  ;;  %v569_v43 = vadd.f32 %v568_v41, %v453_v32 }
 0x105   : > { %1088 = vtanh.f32 %v577_v40 }
 0x106   : > { %1090 = vtanh.f32 %v569_v43  ;;  %v779_v43 = vpop.permute.xlu0 %778 }
 0x108   : > { %v997_v45 = vpop.f32.mrb[4].mxu0 }
 0x109   : > { %v590_v46 = vadd.f32 %v997_v45, %v478_v44  ;;  %v581_v47 = vpop.f32.mrb[5].mxu0 }
 0x10a   : > { %v582_v49 = vadd.f32 %v581_v47, %v468_v37  ;;  %v998_v50 = vpop.f32.mrb[6].mxu0 }
 0x10b   : > { %1092 = vtanh.f32 %v590_v46  ;;  %v593_v51 = vadd.f32 %v998_v50, %v483_v48  ;;  %v584_v52 = vpop.f32.mrb[7].mxu0 }
 0x10c   : > { %1094 = vtanh.f32 %v582_v49  ;;  %v585_v53 = vadd.f32 %v584_v52, %v473_v42  ;;  %v770_v42 = vld [vmem:[%s1459_s7] sm:$0x7]  ;;  %v831_v52 = vpop.permute.xlu1 %830 }
 0x10d   : > { %v1085_v54 = vpop.eup %1084  ;;  %1096 = vtanh.f32 %v593_v51  ;;  %v825_v49 = vld [vmem:[%s424_s29] sm:$0xf]  ;;  %s1124_s29 = scalar_lea.vmem %s1123_s28, 64 }
 0x10e   : > { %v1087_v55 = vpop.eup %1086  ;;  %1098 = vtanh.f32 %v585_v53  ;;  %p1126_p4 = scmp.lt.s32.totalorder %s1124_s29, %s1118_s27 }
 0x10f   : > { %v1089_v56 = vpop.eup %1088 }
 0x110   : > { %v1091_v57 = vpop.eup %1090  ;;  %v613_v58 = vpack.c.bf16 %v1089_v56, %v1085_v54  ;;  %p1127_p5 = por %p1126_p4, %p1125_p3 }
 0x111   : > { %v612_v59 = vpack.c.bf16 %v1091_v57, %v1087_v55 }
 0x112   : > { %p1128_p7 = pnand %p1127_p5, %p1121_p2 }
 0x113   : > { %999 = vmatprep.subr.bf16.mxu1 %v612_v59 }
 0x114   : > { %1000 = vmatpush3.bf16.msra.mxu1 %v612_v59 }
 0x115   : > { %v1093_v60 = vpop.eup %1092  ;;  %1001 = vmatprep.subr.bf16.mxu1 %v613_v58 }
 0x116   : > { %v1095_v61 = vpop.eup %1094 }
 0x117   : > { %v1097_v62 = vpop.eup %1096 }
 0x118   : > { %v1099_v63 = vpop.eup %1098  ;;  %1002 = vmatpush3.bf16.msra.mxu1 %v613_v58  ;;  %v615_v0 = vpack.c.bf16 %v1097_v62, %v1093_v60 }
 0x119   : > { %v614_v1 = vpack.c.bf16 %v1099_v63, %v1095_v61  ;;  %v843_v61 = vstv %s842_s30 }
 0x11b   : > { %1003 = vmatprep.subr.bf16.mxu1 %v614_v1 }
 0x11c   : > { %1004 = vmatpush3.bf16.msra.mxu1 %v614_v1 }
 0x11d   : > { %1005 = vmatprep.subr.bf16.mxu1 %v615_v0 }
 0x120   : > { %1006 = vmatpush3.bf16.msra.mxu1 %v615_v0 }
 0x123   : > { %1008 = vmatmul.mubr.msk.bf16.vlgmr.msra.gmra.mrb[0].mxu1 %vm684_vm2, %v1081_v2 }
 0x124   : > { %1011 = vmatprep.mubr.msk.bf16.mxu1 %vm684_vm2, %v1082_v3 }
 0x12b   : > { %1012 = vmatmul.mubr.msk.bf16.gmra.mrb[4].mxu1 %vm684_vm2, %v1083_v4 }
 0x1f6   : > { %v1009_v10 = vpop.f32.mrb[0].mxu1 }
 0x1f7   : > { %v740_v11 = vadd.f32 %v1009_v10, %v637_v8  ;;  %v731_v12 = vpop.f32.mrb[1].mxu1 }
 0x1f8   : > { %v732_v14 = vadd.f32 %v731_v12, %v627_v6  ;;  %v1010_v15 = vpop.f32.mrb[2].mxu1 }
 0x1f9   : > { %1100 = vtanh.f32 %v740_v11  ;;  %v743_v16 = vadd.f32 %v1010_v15, %v642_v9  ;;  %v734_v17 = vpop.f32.mrb[3].mxu1 }
 0x1fa   : > { %1102 = vtanh.f32 %v732_v14  ;;  %v735_v19 = vadd.f32 %v734_v17, %v632_v7 }
 0x1fb   : > { %1104 = vtanh.f32 %v743_v16 }
 0x1fc   : > { %1106 = vtanh.f32 %v735_v19 }
 0x1fe   : > { %v1013_v21 = vpop.f32.mrb[4].mxu1 }
 0x1ff   : > { %v756_v22 = vadd.f32 %v1013_v21, %v657_v20  ;;  %v747_v23 = vpop.f32.mrb[5].mxu1 }
 0x200   : > { %v748_v25 = vadd.f32 %v747_v23, %v647_v13  ;;  %v1014_v26 = vpop.f32.mrb[6].mxu1 }
 0x201   : > { %1108 = vtanh.f32 %v756_v22  ;;  %v759_v27 = vadd.f32 %v1014_v26, %v662_v24  ;;  %v750_v28 = vpop.f32.mrb[7].mxu1 }
 0x202   : > { %1110 = vtanh.f32 %v748_v25  ;;  %v751_v29 = vadd.f32 %v750_v28, %v652_v18 }
 0x203   : > { %v1101_v30 = vpop.eup %1100  ;;  %1112 = vtanh.f32 %v759_v27 }
 0x204   : > { %v1103_v31 = vpop.eup %1102  ;;  %1114 = vtanh.f32 %v751_v29 }
 0x205   : > { %v1105_v32 = vpop.eup %1104 }
 0x206   : > { %v1107_v33 = vpop.eup %1106  ;;  %v772_v34 = vpack.c.bf16 %v1105_v32, %v1101_v30 }
 0x207   : > { %v771_v35 = vpack.c.bf16 %v1107_v33, %v1103_v31 }
 0x209   : > { %1016 = vmatpush3.bf16.msra.mxu0 %v771_v35 }
 0x20a   : > { %1017 = vmatprep.subr.bf16.mxu0 %v1183_v5 }
 0x20b   : > { %v1109_v36 = vpop.eup %1108 }
 0x20c   : > { %v1111_v37 = vpop.eup %1110 }
 0x20d   : > { %v1113_v38 = vpop.eup %1112  ;;  %1018 = vmatpush3.bf16.msra.mxu0 %v772_v34 }
 0x20e   : > { %v1115_v39 = vpop.eup %1114  ;;  %1019 = vmatprep.subr.bf16.mxu0 %v1183_v5  ;;  %v774_v40 = vpack.c.bf16 %v1113_v38, %v1109_v36 }
 0x20f   : > { %v773_v41 = vpack.c.bf16 %v1115_v39, %v1111_v37 }
 0x211   : > { %1020 = vmatpush3.bf16.msra.mxu0 %v773_v41 }
 0x212   : > { %1021 = vmatprep.subr.bf16.mxu0 %v1183_v5 }
 0x215   : > { %1022 = vmatpush3.bf16.msra.mxu0 %v774_v40 }
 0x218   : > { %1024 = vmatmul.mubr.msk.bf16.vlgmr.msra.gmra.mrb[8].mxu0 %vm684_vm2, %v770_v42 }
 0x2eb   : > { %v818_v44 = vpop.f32.mrb[8].mxu0 }
 0x2ec   : > { %v819_v45 = vadd.f32 %v818_v44, %v779_v43  ;;  %v1025_v46 = vpop.f32.mrb[9].mxu0 }
 0x2ed   : > { %v821_v47 = vpop.f32.mrb[10].mxu0 }
 0x2ee   : > { %1116 = vtanh.f32 %v819_v45  ;;  %846 = vst [vmem:[%s420_s22 - $0x3] sm:$0x10] %v819_v45  ;;  %v1026_v48 = vpop.f32.mrb[11].mxu0 }
 0x2f8   : > { %v1117_v50 = vpop.eup %1116 }
 0x2f9   : > { %v826_v51 = vsub.f32 %v825_v49, %v1117_v50 }
 0x2fb   : > { %v833_v53 = vmul.f32 %v831_v52, %v826_v51 }
 0x2fd   : > { %v834_v54 = vmul.f32 %v833_v53, %v833_v53 }
 0x2ff   : > { %v835_v55 = vsel %vm527_vm1, %v834_v54, 0.0 }
 0x300   : > { %v836_v56 = vrot.slane %v835_v55, 4 }
 0x302   : > { %v837_v57 = vadd.f32 %v836_v56, %v835_v55 }
 0x304   : > { %v838_v58 = vrot.slane %v837_v57, 2 }
 0x306   : > { %v839_v59 = vadd.f32 %v838_v58, %v837_v57 }
 0x308   : > { %v840_v60 = vrot.slane %v839_v59, 1 }
 0x30a   : > { %v841_v62 = vadd.f32 %v840_v60, %v839_v59 }
 0x30c   : > { %v844_v63 = vsub.f32 %v843_v61, %v841_v62 }
 0x30e   : > { %845 = vst [vmem:[%s420_s22] sm:$0x1] %v844_v63 }
 0x30f   : > { %1131 = shalt.err (!%p1128_p7)
}
 0x310   : > { %s1132_s13 = scalar_lea.hbm %s1408_s21, 32  ;;  %s1136_s11 = scalar_lea.hbm %s1462_s10, 64 }
 0x311   : > { %p1133_p10 = scmp.ne.s32.totalorder %s1408_s21, %s1132_s13  ;;  %p1137_p13 = scmp.lt.u32.totalorder %s1408_s21, %s1462_s10 }
 0x312   : > { %p1138_p0 = scmp.lt.u32.totalorder %s1136_s11, %s1132_s13  ;;  %p1140_p2 = scmp.lt.u32.totalorder %s1132_s13, %s1408_s21 }
 0x313   : > { %p1134_p11 = pnand %p1133_p10, %p1283_p6 }
 0x314   : > { %p1139_p1 = por %p1138_p0, %p1137_p13 }
 0x315   : > { %p1135_p12 = pneg %p1134_p11 }
 0x316   : > { %p1141_p3 = por %p1140_p2, %p1139_p1 }
 0x318   : > { %p1142_p4 = pnand %p1141_p3, %p1135_p12 }
 0x31a   : > { %1145 = shalt.err (!%p1142_p4)
}
 0x31b   : > { %1030 = dma.vmem_to_hbm [thread:$0]  (%p1283_p6), %s1410_s12, 32, %s1408_s21, %s848_s26  }
 0x31c PF: > { %s873_s27 = sand.u32 1, %s1168_s15   ;;  %p1033_p5 = pnand %p940_p9, %p1287_p8 }
 0x31d   : > { %s874_s0 = scalar_lea.sflag [#allocation5], %s873_s27 }
 0x31e   : > { %1163 = dma.done.wait (!%p1033_p5), %s874_s0, 32  }
 0x31f   : > { %1165 = vsyncadd (!%p1033_p5), %s874_s0, 4294967264  ;;  %p21_p7 = scmp.ge.s32.totalorder %s1269_s20, 4   ;;  %s1465_s15 = smov %s1172_s16 }
 0x320   : > { %s1466_s16 = smov %s1176_s17  ;;  %s1467_s17 = smov %s1281_s23 }
 0x321   : > { %s1468_s18 = smov %s1269_s20  ;;  %23 = sbr.rel (!%p21_p7) target bundleno = 5 (0x5), region = 144 }
 0x328   :  { %879 = vsyncpa [#allocation5], 1 }
 0x329   :  { %881 = vsyncpa [#allocation5 + $0x1], 1 }

</bundles_post_ra>
